<compile_context>
chip_gen: v6e
topology: v6e:2x2x1
jax: 0.10.0
libtpu: 0.0.40
codegen_flags: <defaults>
</compile_context>

<pallas_src>
import math

import jax
import jax.numpy as jnp
from jax.experimental import pallas as pl
from jax.experimental.pallas import tpu as pltpu

# Module config: WordEmbedding(vocab_size=256, emb_dim=128, padding_idx=0, max_pos=64,
#                              abs_pos=True, reversible=True, tie_weights=True, bias=False)
VOCAB_SIZE = 256
EMB_DIM = 128
MAX_POS = 64
PADDING_IDX = 0

_VMEM_LIMIT = 32 * 1024 * 1024  # safe on v5e/v6e/v7x, covers the larger tiles below


def _round_up(x, m):
    return ((x + m - 1) // m) * m


def _pick_tile(n, cap, align=8):
    """Tile size: multiple of `align`, <= cap, and (when possible) >=2 grid steps so
    dimension_semantics=('parallel',) can shard across v7x's 2 TensorCores."""
    half = -(-n // 2)
    t = _round_up(max(half, 1), align)
    return max(align, min(t, cap))


# ---------------------------------------------------------------------------
# Kernel 1: fused token+position gather as a single "two-hot" @ table MXU matmul.
#   The combined (V_pad + P_pad, D) table is fully VMEM-resident. Each row of the two-hot
#   matrix has a 1 at the token column and (for non-pad tokens) a 1 at V_pad + pos, so one
#   K=384 matmul produces emb_w[tok] + pos_w[pos] * (~is_pad). Pad tokens carry pos col -1
#   (no match -> zero positional contribution), matching addcmul(~is_pad).
# ---------------------------------------------------------------------------
def _embed_kernel(idx_ref, tbl_ref, out_ref):
    T = out_ref.shape[0]
    K = tbl_ref.shape[0]
    idx = idx_ref[...]                     # (T, 2) int32: [:,0]=token id, [:,1]=pos column (or -1)
    ids = idx[:, 0:1]                      # (T, 1)
    pcol = idx[:, 1:2]                     # (T, 1)
    cols = jax.lax.broadcasted_iota(jnp.int32, (T, K), 1)
    two_hot = ((cols == ids) | (cols == pcol)).astype(tbl_ref.dtype)
    out_ref[...] = jnp.dot(
        two_hot, tbl_ref[...], preferred_element_type=jnp.float32
    ).astype(out_ref.dtype)
    # TODO(synk): on v5e (slow f32 MXU) an exact bf16 hi/lo split of the table (two bf16
    # matmuls summed in f32) would recover ~2-3x MXU rate; omitted, v6e/v7x are store-bound.


def word_embedding_forward(tokens, emb_w, pos_w, t_chunk=None, padding_idx=PADDING_IDX):
    """Equivalent of WordEmbedding.forward(inp, reverse=False) with abs_pos=True."""
    B, S = tokens.shape
    n_tok = B * S
    V, D = emb_w.shape
    P = pos_w.shape[0]
    V_pad = _round_up(V, 128)
    P_pad = _round_up(P, 128)
    K = V_pad + P_pad

    # Combined VMEM-resident table: rows [0,V) = emb_w, rows [V_pad, V_pad+P) = pos_w, rest zero.
    tbl = (
        jnp.zeros((K, D), emb_w.dtype)
        .at[:V].set(emb_w)
        .at[V_pad:V_pad + P].set(pos_w)
    )

    # Pad-aware position indices (pure index arithmetic -> plain JAX glue):
    #   pos = arange(S) - cumsum(is_pad), clamped at 0 (torch .sub/.clamp(min=0));
    #   pad tokens get column -1 so their positional contribution vanishes.
    # TODO(synk): the module's debug-mode range asserts on token ids have no kernel equivalent;
    # out-of-range ids are not checked here.
    ids = tokens.reshape(n_tok).astype(jnp.int32)
    is_pad = tokens == padding_idx
    pos = jnp.arange(S, dtype=jnp.int32)[None, :] - jnp.cumsum(is_pad, axis=1).astype(jnp.int32)
    pos = jnp.maximum(pos, 0)
    pcol = jnp.where(is_pad, -1, V_pad + pos).reshape(n_tok).astype(jnp.int32)
    idx = jnp.stack([ids, pcol], axis=1)   # (n_tok, 2) int32 -- single packed index input

    if t_chunk is None:
        t_chunk = _pick_tile(n_tok, cap=1024)
    grid = pl.cdiv(n_tok, t_chunk)

    out_flat = pl.pallas_call(
        _embed_kernel,
        out_shape=jax.ShapeDtypeStruct((n_tok, D), emb_w.dtype),
        grid_spec=pltpu.PrefetchScalarGridSpec(
            num_scalar_prefetch=0,
            grid=(grid,),
            in_specs=[
                pl.BlockSpec((t_chunk, 2), lambda i: (i, 0)),  # packed [token id, pos col]
                pl.BlockSpec((K, D), lambda i: (0, 0)),        # full combined table, VMEM-resident
            ],
            out_specs=pl.BlockSpec((t_chunk, D), lambda i: (i, 0)),
        ),
        compiler_params=pltpu.CompilerParams(
            dimension_semantics=("parallel",),
            vmem_limit_bytes=_VMEM_LIMIT,
        ),
    )(idx, tbl)
    return out_flat.reshape(B, S, D)


# ---------------------------------------------------------------------------
# Kernel 2: reversible head (reverse=True): logits = x @ W^T (W = tied emb weight).
#   The (V, D) weight stays VMEM-resident as-is; the kernel contracts on W's last dim
#   (A @ B^T form) so no wrapper-side transpose is needed. Token axis tiled & 'parallel'.
# ---------------------------------------------------------------------------
def _head_kernel(x_ref, w_ref, out_ref):
    out_ref[...] = jax.lax.dot_general(
        x_ref[...], w_ref[...],
        dimension_numbers=(((1,), (1,)), ((), ())),
        preferred_element_type=jnp.float32,
    ).astype(out_ref.dtype)


def word_embedding_reverse(x, head_w, tm=None, compute_dtype=None):
    """Equivalent of WordEmbedding.forward(inp, reverse=True) (nn.Linear, bias=False).

    compute_dtype=jnp.bfloat16 casts the matmul inputs (f32 accumulation kept) for ~2-3x MXU
    rate and half the x read traffic on v6e/v7x; default None preserves exact f32 semantics.
    """
    # TODO(synk): bias=True branch of the head is omitted (module default is bias=False).
    *lead, D = x.shape
    M = math.prod(lead) if lead else 1
    V = head_w.shape[0]
    x2 = x.reshape(M, D)
    w = head_w
    if compute_dtype is not None:
        x2 = x2.astype(compute_dtype)
        w = w.astype(compute_dtype)

    if tm is None:
        tm = _pick_tile(M, cap=4096)
    grid = pl.cdiv(M, tm)

    out = pl.pallas_call(
        _head_kernel,
        out_shape=jax.ShapeDtypeStruct((M, V), x.dtype),
        grid_spec=pltpu.PrefetchScalarGridSpec(
            num_scalar_prefetch=0,
            grid=(grid,),
            in_specs=[
                pl.BlockSpec((tm, D), lambda i: (i, 0)),   # token-row tile
                pl.BlockSpec((V, D), lambda i: (0, 0)),    # full tied weight, VMEM-resident
            ],
            out_specs=pl.BlockSpec((tm, V), lambda i: (i, 0)),
        ),
        compiler_params=pltpu.CompilerParams(
            dimension_semantics=("parallel",),
            vmem_limit_bytes=_VMEM_LIMIT,
        ),
    )(x2, w)
    return out.reshape(*lead, V)


if __name__ == "__main__":
    key = jax.random.PRNGKey(0)
    k_emb, k_pos, k_tok = jax.random.split(key, 3)

    # reset_params(): trunc_normal_(std=emb_dim**-0.5), padding row zeroed, weights tied.
    std = EMB_DIM ** (-0.5)
    emb_w = jax.random.truncated_normal(k_emb, -2.0, 2.0, (VOCAB_SIZE, EMB_DIM), jnp.float32) * std
    emb_w = emb_w.at[PADDING_IDX].set(0.0)
    pos_w = jax.random.truncated_normal(k_pos, -2.0, 2.0, (MAX_POS, EMB_DIM), jnp.float32) * std
    head_w = emb_w  # tie_weights=True

    B, S = 2, 8
    tokens = jax.random.randint(k_tok, (B, S), 0, VOCAB_SIZE, dtype=jnp.int32)
    tokens = tokens.at[:, :2].set(PADDING_IDX)  # include padding tokens to exercise masking

    fwd = jax.jit(word_embedding_forward)
    rev = jax.jit(word_embedding_reverse)

    out = fwd(tokens, emb_w, pos_w)     # [B, S, EMB_DIM]
    logits = rev(out, head_w)           # [B, S, VOCAB_SIZE]
    jax.block_until_ready((out, logits))

    # plain-JAX reference check
    is_pad = tokens == PADDING_IDX
    pos_ref = jnp.maximum(jnp.arange(S)[None, :] - jnp.cumsum(is_pad, axis=1), 0)
    ref_out = emb_w[tokens] + pos_w[pos_ref] * (~is_pad)[..., None].astype(jnp.float32)
    ref_logits = out.reshape(B * S, EMB_DIM) @ head_w.T

    assert out.shape == (B, S, EMB_DIM) and logits.shape == (B, S, VOCAB_SIZE)
    assert jnp.allclose(out, ref_out, atol=1e-5, rtol=1e-5)
    assert jnp.allclose(logits.reshape(B * S, VOCAB_SIZE), ref_logits, atol=1e-4, rtol=1e-4)
    print("KERNEL_OK")
</pallas_src>

<mosaic_0001>
module attributes {stable_mosaic.version = 11 : i64} {
  func.func @_embed_kernel(%arg0: i32, %arg1: memref<8x2xi32, #tpu.memory_space<vmem>>, %arg2: memref<384x128xf32, #tpu.memory_space<vmem>>, %arg3: memref<8x128xf32, #tpu.memory_space<vmem>>) attributes {dimension_semantics = [#tpu.dimension_semantics<parallel>], iteration_bounds = array<i64: 2>, scalar_prefetch = 0 : i64, scratch_operands = 0 : i64, tpu.core_type = #tpu.core_type<tc>, window_params = [{transform_indices = @transform_0, window_bounds = array<i64: 8, 2>}, {pipeline_mode = #tpu.pipeline_mode<synchronous>, transform_indices = @transform_1, window_bounds = array<i64: 384, 128>}, {transform_indices = @transform_2, window_bounds = array<i64: 8, 128>}]} {
    %c0 = arith.constant 0 : index
    %c0_0 = arith.constant 0 : index
    %0 = vector.load %arg1[%c0, %c0_0] : memref<8x2xi32, #tpu.memory_space<vmem>>, vector<8x2xi32>
    %1 = vector.extract_strided_slice %0 {offsets = [0, 0], sizes = [8, 1], strides = [1, 1]} : vector<8x2xi32> to vector<8x1xi32>
    %2 = vector.extract_strided_slice %0 {offsets = [0, 1], sizes = [8, 1], strides = [1, 1]} : vector<8x2xi32> to vector<8x1xi32>
    %3 = tpu.iota {dimensions = array<i32: 1>} : vector<8x384xi32>
    %4 = vector.broadcast %1 : vector<8x1xi32> to vector<8x384xi32>
    %5 = arith.cmpi eq, %3, %4 : vector<8x384xi32>
    %6 = vector.broadcast %2 : vector<8x1xi32> to vector<8x384xi32>
    %7 = arith.cmpi eq, %3, %6 : vector<8x384xi32>
    %8 = arith.ori %5, %7 : vector<8x384xi1>
    %9 = arith.extui %8 : vector<8x384xi1> to vector<8x384xi32>
    %10 = arith.sitofp %9 : vector<8x384xi32> to vector<8x384xf32>
    %c0_1 = arith.constant 0 : index
    %c0_2 = arith.constant 0 : index
    %11 = vector.load %arg2[%c0_1, %c0_2] : memref<384x128xf32, #tpu.memory_space<vmem>>, vector<384x128xf32>
    %cst = arith.constant dense<0.000000e+00> : vector<8x128xf32>
    %12 = tpu.matmul %10, %11, %cst {dimension_numbers = #tpu.dot_dimension_numbers<[1], [0], [0], [1], [0, 0, 1, 1], [], []>} : vector<8x384xf32>, vector<384x128xf32>, vector<8x128xf32> -> vector<8x128xf32>
    %c0_3 = arith.constant 0 : index
    %c0_4 = arith.constant 0 : index
    %13 = vector.load %arg3[%c0_3, %c0_4] : memref<8x128xf32, #tpu.memory_space<vmem>>, vector<8x128xf32>
    tpu.vector_store %arg3[%c0_3, %c0_4], %12 {strides = array<i32>} : memref<8x128xf32, #tpu.memory_space<vmem>>, vector<8x128xf32>,
    return
  }
  func.func @transform_0(%arg0: i32) -> (i32, i32) {
    %c0_i32 = arith.constant 0 : i32
    %c0_i32_0 = arith.constant 0 : i32
    return %arg0, %c0_i32 : i32, i32
  }
  func.func @transform_1(%arg0: i32) -> (i32, i32) {
    %c0_i32 = arith.constant 0 : i32
    %c0_i32_0 = arith.constant 0 : i32
    %c0_i32_1 = arith.constant 0 : i32
    return %c0_i32, %c0_i32_0 : i32, i32
  }
  func.func @transform_2(%arg0: i32) -> (i32, i32) {
    %c0_i32 = arith.constant 0 : i32
    %c0_i32_0 = arith.constant 0 : i32
    return %arg0, %c0_i32 : i32, i32
  }
}

</mosaic_0001>

<bundles_post_ra>
// kernel: word_embedding_forward.1
= control target key start
LH: loop header
LB: loop body
LE: loop exit
PB: predicated region body
PF: predicated region fallthrough
CT: control target
= control target key end

     0   :  { %7 = vsyncpa [#allocation3], 0  ;;  %s907_s0 = inlined_call_operand.vmem [shape: s32[16,2], index: 0, kind: input, shape index: {}]   ;;  %s908_s1 = inlined_call_operand.vmem [shape: f32[384,128], index: 1, kind: input, shape index: {}]   ;;  %s909_s2 = inlined_call_operand.hbm [shape: f32[16,128], index: 2, kind: output, shape index: {}]  }
   0x1   :  { %9 = vsyncpa [#allocation3 + $0x1], 0  ;;  %s659_s9 = smov 0   ;;  %s661_s10 = smov 0  }
   0x2   :  { %s663_s11 = smov 0   ;;  %s665_s12 = smov 0  }
   0x3 LB: > { %s680_s13 = sadd.s32 4294967295, %s636_s12   ;;  %s427_s14 = sadd.s32 4294967294, %s636_s12   ;;  %s636_s12 = sphi %s665_s12, %s915_s12   ;;  %s632_s11 = sphi %s663_s11, %s914_s11   ;;  %s628_s10 = sphi %s661_s10, %s913_s10   ;;  %s624_s9 = sphi %s659_s9, %s912_s9  }
   0x4   : > { %s684_s15 = sadd.s32 1, %s636_s12   ;;  %s69_s16 = sadd.s32 1, %s632_s11 }
   0x5   : > { %s66_s17 = ssub.s32 %s636_s12, %s684_s15  ;;  %p79_p0 = scmp.ne.s32.totalorder %s632_s11, %s628_s10 }
   0x6   : > { %p67_p1 = scmp.eq.s32.totalorder %s66_s17, 0  ;;  %p80_p2 = scmp.eq.s32.totalorder %s680_s13, 1 }
   0x7   : > { %p85_p3 = scmp.ne.s32.totalorder %s628_s10, %s624_s9  ;;  %p86_p4 = scmp.eq.s32.totalorder %s427_s14, 1 }
   0x8   : > { %s695_s18 = scalar_select %p67_p1, %s632_s11, %s69_s16  }
   0x9   : > { %p697_p5 = por %p80_p2, %p79_p0  ;;  %p701_p6 = por %p86_p4, %p85_p3 }
   0xa   : > { %p430_p7 = scmp.ge.s32.totalorder %s636_s12, 1  ;;  %p114_p8 = scmp.lt.s32.totalorder %s636_s12, 3 }
   0xc   : > { %p115_p9 = pnand %p430_p7, %p114_p8 }
   0xd   : > { %p135_p10 = scmp.lt.s32.totalorder (!%p115_p9), %s680_s13, 1  ;;  %s132_s27 = sand.u32 (!%p115_p9), 1, %s628_s10  }
   0xe   : > { %118 = sbr.rel (%p115_p9) target bundleno = 372 (0x174), region = 28  ;;  %s431_s28 = sshll.u32 (!%p115_p9), %s132_s27, 3 }
   0xf   : > { %s440_s29 = sshll.u32 (!%p115_p9), %s680_s13, 7  ;;  %s134_s30 = scalar_lea.vmem (!%p115_p9), [#allocation2], %s431_s28 }
  0x10   : > { %s366_s6 = scalar_lea.hbm (!%p115_p9), %s909_s2, %s440_s29  ;;  %s355_s7 = scalar_lea.sflag (!%p115_p9), [#allocation3], %s132_s27 }
  0x11   : > { %s643_s14 = smov (!%p115_p9), [#allocation2]  }
  0x13   : > { %v196_v0 = vld [vmem:[%s908_s1 + $0xf8] sm:$0xff]  ;;  %v638_v2 = vmov 0   ;;  %v639_v3 = vmov 0.0   ;;  %v195_v5 = vld [vmem:[%s908_s1 + $0xf0] sm:$0xff]  ;;  %s136_s3 = scalar_select %p135_p10, %s680_s13, 1  ;;  %v194_v8 = vld [vmem:[%s908_s1 + $0xe8] sm:$0xff]  ;;  %v140_v52 = vlaneseq }
  0x14   : > { %v212_v1 = vld [vmem:[%s908_s1 + $0x178] sm:$0xff]  ;;  %574 = vset.pattern.permute.xlu0 %v638_v2  ;;  %495 = vmatprep.subr.mxu1 %v639_v3  ;;  %v211_v6 = vld [vmem:[%s908_s1 + $0x170] sm:$0xff]  ;;  %v210_v9 = vld [vmem:[%s908_s1 + $0x168] sm:$0xff]  ;;  %v640_v19 = vmov 1   ;;  %vm641_vm0 = vmmov 0   ;;  %v642_v58 = vmov 1.0  }
  0x15   : > { %v180_v4 = vld [vmem:[%s908_s1 + $0x78] sm:$0xff]  ;;  %443 = vmatprep.subr.mxu0 %v196_v0  ;;  %496 = vmatpush3.msra.mxu1 %v212_v1  ;;  %v179_v7 = vld [vmem:[%s908_s1 + $0x70] sm:$0xff]  ;;  %s432_s16 = sshll.u32 %s136_s3, 3  ;;  %v178_v10 = vld [vmem:[%s908_s1 + $0x68] sm:$0xff]  ;;  %v141_v53 = vand.u32 127, %v140_v52  ;;  %s368_s3 = sshll.u32 %s134_s30, 4  ;;  %s369_s3 = int_to_ptr.vmem [resolvable:$true] %s368_s3 }
  0x16   : > { %444 = vmatpush3.msra.mxu0 %v180_v4  ;;  %497 = vmatprep.subr.mxu1 %v639_v3  ;;  %s138_s24 = scalar_lea.vmem %s907_s0, %s432_s16  ;;  %v193_v11 = vld [vmem:[%s908_s1 + $0xe0] sm:$0xff]  ;;  %v192_v15 = vld [vmem:[%s908_s1 + $0xd8] sm:$0xff]  ;;  %v191_v18 = vld [vmem:[%s908_s1 + $0xd0] sm:$0xff]  ;;  %s576_s8 = scalar_lea.vmem %s369_s3, 128 }
  0x17   : > { %445 = vmatprep.subr.mxu0 %v195_v5  ;;  %498 = vmatpush3.msra.mxu1 %v211_v6  ;;  %v139_v12 = vld [vmem:[%s138_s24] sm:$0xff]  ;;  %v208_v16 = vld [vmem:[%s908_s1 + $0x158] sm:$0xff]  ;;  %v207_v20 = vld [vmem:[%s908_s1 + $0x150] sm:$0xff]  ;;  %v143_v55 = vadd.s32 256, %v141_v53  ;;  %v142_v56 = vadd.s32 128, %v141_v53  ;;  %p577_p11 = scmp.ne.s32.totalorder %s369_s3, %s576_s8  ;;  %s580_s16 = sshll.u32 %s643_s14, 4  ;;  %s581_s16 = int_to_ptr.vmem [resolvable:$false] %s580_s16 }
  0x18   : > { %446 = vmatpush3.msra.mxu0 %v179_v7  ;;  %499 = vmatprep.subr.mxu1 %v639_v3  ;;  %v209_v13 = vld [vmem:[%s908_s1 + $0x160] sm:$0xff]  ;;  %v176_v17 = vld [vmem:[%s908_s1 + $0x58] sm:$0xff]  ;;  %v175_v21 = vld [vmem:[%s908_s1 + $0x50] sm:$0xff]  ;;  %s582_s13 = scalar_lea.vmem %s581_s16, 256  ;;  %p583_p0 = scmp.lt.s32.totalorder %s369_s3, %s581_s16 }
  0x19   : > { %447 = vmatprep.subr.mxu0 %v194_v8  ;;  %500 = vmatpush3.msra.mxu1 %v210_v9  ;;  %v177_v14 = vld [vmem:[%s908_s1 + $0x60] sm:$0xff]  ;;  %v190_v22 = vld [vmem:[%s908_s1 + $0xc8] sm:$0xff]  ;;  %v188_v28 = vld [vmem:[%s908_s1 + $0xb8] sm:$0xff]  ;;  %p578_p12 = pnand %p577_p11, %p697_p5  ;;  %p584_p1 = scmp.lt.s32.totalorder %s582_s13, %s576_s8 }
  0x1a   : > { %145 = vperm.xlu0 %574, %v139_v12   ;;  %448 = vmatpush3.msra.mxu0 %v178_v10  ;;  %v206_v23 = vld [vmem:[%s908_s1 + $0x148] sm:$0xff]  ;;  %v189_v25 = vld [vmem:[%s908_s1 + $0xc0] sm:$0xff]  ;;  %v204_v29 = vld [vmem:[%s908_s1 + $0x138] sm:$0xff] }
  0x1b   : > { %501 = vmatprep.subr.mxu1 %v639_v3  ;;  %449 = vmatprep.subr.mxu0 %v193_v11  ;;  %v174_v24 = vld [vmem:[%s908_s1 + $0x48] sm:$0xff]  ;;  %v205_v26 = vld [vmem:[%s908_s1 + $0x140] sm:$0xff]  ;;  %v172_v30 = vld [vmem:[%s908_s1 + $0x38] sm:$0xff]  ;;  %p579_p13 = pneg %p578_p12  ;;  %p585_p2 = por %p584_p1, %p583_p0 }
  0x1c   : > { %502 = vmatpush3.msra.mxu1 %v209_v13  ;;  %450 = vmatpush3.msra.mxu0 %v177_v14  ;;  %v173_v27 = vld [vmem:[%s908_s1 + $0x40] sm:$0xff]  ;;  %v187_v31 = vld [vmem:[%s908_s1 + $0xb0] sm:$0xff]  ;;  %v186_v34 = vld [vmem:[%s908_s1 + $0xa8] sm:$0xff] }
  0x1d   : > { %503 = vmatprep.subr.mxu1 %v639_v3  ;;  %451 = vmatprep.subr.mxu0 %v192_v15  ;;  %v203_v32 = vld [vmem:[%s908_s1 + $0x130] sm:$0xff]  ;;  %v202_v35 = vld [vmem:[%s908_s1 + $0x128] sm:$0xff]  ;;  %v185_v37 = vld [vmem:[%s908_s1 + $0xa0] sm:$0xff]  ;;  %p586_p3 = pnand %p585_p2, %p579_p13 }
  0x1e   : > { %575 = vset.pattern.permute.xlu0 %v640_v19  ;;  %504 = vmatpush3.msra.mxu1 %v208_v16  ;;  %v171_v33 = vld [vmem:[%s908_s1 + $0x30] sm:$0xff]  ;;  %v170_v36 = vld [vmem:[%s908_s1 + $0x28] sm:$0xff]  ;;  %v201_v38 = vld [vmem:[%s908_s1 + $0x120] sm:$0xff] }
  0x1f   : > { %151 = vperm.xlu0 %575, %v139_v12   ;;  %452 = vmatpush3.msra.mxu0 %v176_v17  ;;  %v169_v39 = vld [vmem:[%s908_s1 + $0x20] sm:$0xff]  ;;  %v184_v40 = vld [vmem:[%s908_s1 + $0x98] sm:$0xff]  ;;  %v183_v43 = vld [vmem:[%s908_s1 + $0x90] sm:$0xff] }
  0x20   : > { %505 = vmatprep.subr.mxu1 %v639_v3  ;;  %453 = vmatprep.subr.mxu0 %v191_v18  ;;  %v200_v41 = vld [vmem:[%s908_s1 + $0x118] sm:$0xff]  ;;  %v199_v44 = vld [vmem:[%s908_s1 + $0x110] sm:$0xff]  ;;  %v182_v46 = vld [vmem:[%s908_s1 + $0x88] sm:$0xff] }
  0x21   : > { %506 = vmatpush3.msra.mxu1 %v207_v20  ;;  %454 = vmatpush3.msra.mxu0 %v175_v21  ;;  %v168_v42 = vld [vmem:[%s908_s1 + $0x18] sm:$0xff]  ;;  %v167_v45 = vld [vmem:[%s908_s1 + $0x10] sm:$0xff]  ;;  %v198_v47 = vld [vmem:[%s908_s1 + $0x108] sm:$0xff] }
  0x22   : > { %507 = vmatprep.subr.mxu1 %v639_v3  ;;  %455 = vmatprep.subr.mxu0 %v190_v22  ;;  %v166_v48 = vld [vmem:[%s908_s1 + $0x8] sm:$0xff]  ;;  %v181_v49 = vld [vmem:[%s908_s1 + $0x80] sm:$0xff] }
  0x23   : > { %508 = vmatpush3.msra.mxu1 %v206_v23  ;;  %456 = vmatpush3.msra.mxu0 %v174_v24  ;;  %v197_v50 = vld [vmem:[%s908_s1 + $0x100] sm:$0xff] }
  0x24   : > { %509 = vmatprep.subr.mxu1 %v639_v3  ;;  %457 = vmatprep.subr.mxu0 %v189_v25  ;;  %v165_v51 = vld [vmem:[%s908_s1] sm:$0xff] }
  0x25   : > { %510 = vmatpush3.msra.mxu1 %v205_v26  ;;  %458 = vmatpush3.msra.mxu0 %v173_v27 }
  0x26   : > { %511 = vmatprep.subr.mxu1 %v639_v3  ;;  %459 = vmatprep.subr.mxu0 %v188_v28 }
  0x27   : > { %512 = vmatpush3.msra.mxu1 %v204_v29  ;;  %460 = vmatpush3.msra.mxu0 %v172_v30 }
  0x28   : > { %513 = vmatprep.subr.mxu1 %v639_v3  ;;  %461 = vmatprep.subr.mxu0 %v187_v31 }
  0x29   : > { %514 = vmatpush3.msra.mxu1 %v203_v32  ;;  %462 = vmatpush3.msra.mxu0 %v171_v33 }
  0x2a   : > { %515 = vmatprep.subr.mxu1 %v639_v3  ;;  %463 = vmatprep.subr.mxu0 %v186_v34 }
  0x2b   : > { %516 = vmatpush3.msra.mxu1 %v202_v35  ;;  %464 = vmatpush3.msra.mxu0 %v170_v36 }
  0x2c   : > { %517 = vmatprep.subr.mxu1 %v639_v3  ;;  %465 = vmatprep.subr.mxu0 %v185_v37 }
  0x2d   : > { %518 = vmatpush3.msra.mxu1 %v201_v38  ;;  %466 = vmatpush3.msra.mxu0 %v169_v39 }
  0x2e   : > { %519 = vmatprep.subr.mxu1 %v639_v3  ;;  %467 = vmatprep.subr.mxu0 %v184_v40 }
  0x2f   : > { %520 = vmatpush3.msra.mxu1 %v200_v41  ;;  %468 = vmatpush3.msra.mxu0 %v168_v42 }
  0x30   : > { %521 = vmatprep.subr.mxu1 %v639_v3  ;;  %469 = vmatprep.subr.mxu0 %v183_v43 }
  0x31   : > { %522 = vmatpush3.msra.mxu1 %v199_v44  ;;  %470 = vmatpush3.msra.mxu0 %v167_v45 }
  0x32   : > { %523 = vmatprep.subr.mxu1 %v639_v3  ;;  %471 = vmatprep.subr.mxu0 %v182_v46 }
  0x33   : > { %524 = vmatpush3.msra.mxu1 %v198_v47  ;;  %472 = vmatpush3.msra.mxu0 %v166_v48 }
  0x34   : > { %525 = vmatprep.subr.mxu1 %v639_v3  ;;  %473 = vmatprep.subr.mxu0 %v181_v49 }
  0x35   : > { %526 = vmatpush3.msra.mxu1 %v197_v50  ;;  %527 = vmatprep.mubr.msk.f32.mxu1 %vm641_vm0, %v639_v3 }
  0x36   : > { %474 = vmatpush3.msra.mxu0 %v165_v51 }
  0x95   : > { %v146_v54 = vpop.permute.xlu0 %145 }
  0x96   : > { %vm147_vm1 = vcmp.eq.s32.totalorder %v141_v53, %v146_v54  ;;  %vm149_vm5 = vcmp.eq.s32.totalorder %v143_v55, %v146_v54  ;;  %vm148_vm8 = vcmp.eq.s32.totalorder %v142_v56, %v146_v54 }
  0x9a   : > { %v152_v57 = vpop.permute.xlu0 %151 }
  0x9b   : > { %vm153_vm2 = vcmp.eq.s32.totalorder %v141_v53, %v152_v57  ;;  %vm155_vm3 = vcmp.eq.s32.totalorder %v143_v55, %v152_v57  ;;  %vm154_vm4 = vcmp.eq.s32.totalorder %v142_v56, %v152_v57 }
  0x9c   : > { %vm156_vm6 = vmor %vm147_vm1, %vm153_vm2 }
  0x9d   : > { %vm158_vm7 = vmor %vm149_vm5, %vm155_vm3 }
  0x9e   : > { %vm157_vm9 = vmor %vm148_vm8, %vm154_vm4  ;;  %528 = vmatmul.mubr.msk.f32.vlgmr.msra.gmra.mxu1 %vm158_vm7, %v642_v58 }
  0x9f   : > { %436 = vmatprep.mubr.msk.f32.mxu0 %vm157_vm9, %v642_v58 }
  0xa0   : > { %437 = vmatmul.mubr.msk.f32.vlgmr.msra.gmra.mxu0 %vm156_vm6, %v642_v58 }
 0x15e   : > { %v349_v59 = vpop.f32.mrf.mxu1 }
 0x160   : > { %v475_v60 = vpop.f32.mrf.mxu0  ;;  %v529_v61 = vpop.f32.mrf.mxu1 }
 0x162   : > { %v476_v62 = vpop.f32.mrf.mxu0 }
 0x163   : > { %v477_v63 = vadd.f32 %v476_v62, %v475_v60 }
 0x165   : > { %v350_v0 = vadd.f32 %v477_v63, %v349_v59 }
 0x167   : > { %353 = vst [vmem:[%s134_s30] sm:$0xff] %v350_v0 }
 0x168   : > { %589 = shalt.err (!%p586_p3)
}
 0x169   : > { %s590_s17 = scalar_lea.hbm %s366_s6, 128  ;;  %s594_s23 = scalar_lea.hbm %s909_s2, 256 }
 0x16a   : > { %p591_p4 = scmp.ne.s32.totalorder %s366_s6, %s590_s17  ;;  %p595_p9 = scmp.lt.s32.totalorder %s366_s6, %s909_s2 }
 0x16b   : > { %p596_p10 = scmp.lt.s32.totalorder %s594_s23, %s590_s17 }
 0x16c   : > { %p592_p7 = pnand %p591_p4, %p697_p5 }
 0x16d   : > { %p597_p11 = por %p596_p10, %p595_p9 }
 0x16e   : > { %p593_p8 = pneg %p592_p7 }
 0x170   : > { %p598_p12 = pnand %p597_p11, %p593_p8 }
 0x172   : > { %601 = shalt.err (!%p598_p12)
}
 0x173   : > { %530 = dma.vmem_to_hbm [thread:$0]  (%p697_p5), %s369_s3, 128, %s366_s6, %s355_s7  }
 0x174 PF: > { %p536_p13 = scmp.ge.s32.totalorder %s636_s12, 2  ;;  %s380_s26 = sand.u32 1, %s624_s9  }
 0x175   : > { %s381_s27 = scalar_lea.sflag [#allocation3], %s380_s26 }
 0x176   : > { %p533_p0 = pnand %p536_p13, %p701_p6 }
 0x178   : > { %p534_p1 = pneg %p533_p0 }
 0x17a   : > { %619 = dma.done.wait (%p534_p1), %s381_s27, 128  }
 0x17b   : > { %621 = vsyncadd (%p534_p1), %s381_s27, 4294967168  ;;  %p12_p2 = scmp.ge.s32.totalorder %s684_s15, 4   ;;  %s912_s9 = smov %s628_s10 }
 0x17c   : > { %s913_s10 = smov %s632_s11  ;;  %s914_s11 = smov %s695_s18 }
 0x17d   : > { %s915_s12 = smov %s684_s15  ;;  %14 = sbr.rel (!%p12_p2) target bundleno = 3 (0x3), region = 63 }
 0x182   :  { %386 = vsyncpa [#allocation3], 1 }
 0x183   :  { %388 = vsyncpa [#allocation3 + $0x1], 1 }

</bundles_post_ra>
